<compile_context>
chip_gen: v7x
topology: tpu7x:2x2x1
jax: 0.10.0
libtpu: 0.0.40
codegen_flags: <defaults>
</compile_context>

<pallas_src>
import jax
import jax.numpy as jnp
from jax import lax
from jax.experimental import pallas as pl
from jax.experimental.pallas import tpu as pltpu

_LANE = 128
_BLOCK_BUDGET_BYTES = 4 << 20   # target HBM bytes per input block per grid step
_VMEM_TARGET_BYTES = 28 << 20   # cap on estimated VMEM working set
_VMEM_LIMIT_BYTES = 48 << 20    # scoped-VMEM ceiling we request (safe v5e/v6e/v7x)


def _round_up(x, m):
    return ((x + m - 1) // m) * m


def _round_down8(x):
    return max(8, (x // 8) * 8)


def _make_l2_partial_kernel(C, r_tile, lane, valid_rows, needs_mask):
    """Kernel over one (1, C, r_tile, lane) spatial tile of one batch element."""

    def kernel(pred_ref, tgt_ref, part_ref):
        # Channel reduction: unrolled loop of VPU mul/adds over channel slabs;
        # no (1, C, r_tile, lane) product temporary is materialized.
        acc = None
        for c in range(C):
            p = pred_ref[0, c, :, :]
            t = tgt_ref[0, c, :, :]
            if p.dtype != jnp.float32:   # per-operand upcast (static check)
                p = p.astype(jnp.float32)
            if t.dtype != jnp.float32:
                t = t.astype(jnp.float32)
            d = p - t
            acc = d * d if acc is None else acc + d * d
        epe = jnp.sqrt(acc)                              # (r_tile, lane), EUP

        if needs_mask:
            # Ragged tail: rows past the true extent hold whatever the clamped
            # DMA left in the VMEM buffer; zero them before accumulating.
            row0 = pl.program_id(1) * r_tile
            rid = lax.broadcasted_iota(jnp.int32, (r_tile, lane), 0)
            epe = jnp.where(row0 + rid < valid_rows, epe, 0.0)

        # Lane-dense per-tile partial: reduce over the row (sublane) axis only;
        # the cross-lane reduce is deferred to the tiny wrapper-side sum.
        part_ref[...] = jnp.sum(epe, axis=0)[None, None, None, :]

    return kernel


def l2_loss_forward(output, target, mul_scale=1.0, mean=True,
                    block_budget_bytes=None):
    """Returns [lossvalue, epevalue] matching L2Loss.forward."""
    assert output.shape == target.shape, (output.shape, target.shape)
    B, C, H, W = output.shape
    HW = H * W
    dsize = max(jnp.dtype(output.dtype).itemsize, jnp.dtype(target.dtype).itemsize)
    budget = _BLOCK_BUDGET_BYTES if block_budget_bytes is None else block_budget_bytes

    if HW % _LANE == 0:
        # Zero-copy fast path: contiguous reshape, 128 spatial pixels per row.
        rows, lane = HW // _LANE, _LANE
        pred = output.reshape(B, C, rows, lane)
        tgt = target.reshape(B, C, rows, lane)
    else:
        # Zero-copy fallback: tile NCHW directly; full-extent W is the lane dim.
        rows, lane = H, W
        pred, tgt = output, target

    lane_pad = _round_up(lane, _LANE)       # VMEM lane footprint per row

    # dtype-aware row tile from the byte budget (multiple of 8 sublanes), then
    # shrink until the estimated VMEM working set fits every generation.
    r_tile = _round_down8(budget // (C * lane_pad * dsize))

    def _vmem_est(rt):
        blk = C * rt * lane_pad * dsize          # one input block in VMEM
        tmp = 3 * rt * lane_pad * 4              # f32 acc/epe/mask temporaries
        return 4 * blk + tmp                     # 2 inputs x 2 pipeline buffers

    while _vmem_est(r_tile) > _VMEM_TARGET_BYTES and r_tile > 8:
        r_tile = _round_down8(r_tile // 2)
    if r_tile >= rows:
        r_tile = rows        # full-extent row dim: exempt from 8-divisibility

    n_tiles = pl.cdiv(rows, r_tile)
    needs_mask = (rows % r_tile) != 0

    kernel = _make_l2_partial_kernel(C, r_tile, lane, rows, needs_mask)

    cost = pl.CostEstimate(
        flops=4 * B * C * H * W,                  # sub, mul, add (+ epilogue)
        transcendentals=B * H * W,                # one sqrt per pixel
        bytes_accessed=2 * B * C * HW * dsize + B * n_tiles * lane * 4,
    )

    partials = pl.pallas_call(
        kernel,
        out_shape=jax.ShapeDtypeStruct((B, n_tiles, 1, lane), jnp.float32),
        grid_spec=pltpu.PrefetchScalarGridSpec(
            num_scalar_prefetch=0,
            grid=(B, n_tiles),
            in_specs=[
                pl.BlockSpec((1, C, r_tile, lane), lambda b, s: (b, 0, s, 0)),
                pl.BlockSpec((1, C, r_tile, lane), lambda b, s: (b, 0, s, 0)),
            ],
            out_specs=pl.BlockSpec((1, 1, 1, lane), lambda b, s: (b, s, 0, 0)),
        ),
        compiler_params=pltpu.CompilerParams(
            # Every grid point owns its own output block -> fully parallel
            # (lets v7x shard across both TensorCores; harmless on v5e/v6e).
            dimension_semantics=("parallel", "parallel"),
            vmem_limit_bytes=_VMEM_LIMIT_BYTES,
        ),
        cost_estimate=cost,
    )(pred, tgt)

    total = jnp.sum(partials, dtype=jnp.float32)
    denom = jnp.float32(B * H * W) if mean else jnp.float32(B)
    value = jnp.float32(mul_scale) * (total / denom)
    # L2 and EPE are the same quantity by construction in the reference module.
    return [value, value]


def _reference(output, target, mul_scale=1.0, mean=True):
    diff = output.astype(jnp.float32) - target.astype(jnp.float32)
    epe_map = jnp.sqrt(jnp.sum(diff * diff, axis=1))      # (B, H, W)
    v = jnp.mean(epe_map) if mean else jnp.sum(epe_map) / epe_map.shape[0]
    return [mul_scale * v, mul_scale * v]


if __name__ == "__main__":
    root = jax.random.PRNGKey(0)

    def run_case(key, shape, block_budget_bytes=None, mul_scale=1.0):
        k1, k2 = jax.random.split(key)
        out = jax.random.normal(k1, shape, dtype=jnp.float32)
        tgt = jax.random.normal(k2, shape, dtype=jnp.float32)
        loss, epe = l2_loss_forward(out, tgt, mul_scale=mul_scale,
                                    block_budget_bytes=block_budget_bytes)
        jax.block_until_ready(loss)
        jax.block_until_ready(epe)
        ref_loss, ref_epe = _reference(out, tgt, mul_scale=mul_scale)
        assert jnp.allclose(loss, ref_loss, rtol=1e-5, atol=1e-5), (shape, loss, ref_loss)
        assert jnp.allclose(epe, ref_epe, rtol=1e-5, atol=1e-5), (shape, epe, ref_epe)

    keys = jax.random.split(root, 3)
    # Flow-like NCHW tensor; H*W % 128 == 0 -> zero-copy reshape fast path.
    run_case(keys[0], (2, 2, 16, 16))
    # Fast path with a ragged grid tail (tiny forced tile) -> in-kernel masking.
    run_case(keys[1], (2, 2, 36, 128), block_budget_bytes=8 * 1024)
    # H*W not a multiple of 128 -> direct NCHW tiling (full-extent W lanes) + masking.
    run_case(keys[2], (2, 2, 20, 9), block_budget_bytes=8 * 1024)
    print("KERNEL_OK")
</pallas_src>

<mosaic_0001>
module attributes {stable_mosaic.version = 11 : i64} {
  func.func @kernel(%arg0: i32, %arg1: i32, %arg2: memref<1x2x2x128xf32, #tpu.memory_space<vmem>>, %arg3: memref<1x2x2x128xf32, #tpu.memory_space<vmem>>, %arg4: memref<1x1x1x128xf32, #tpu.memory_space<vmem>>) attributes {dimension_semantics = [#tpu.dimension_semantics<parallel>, #tpu.dimension_semantics<parallel>], iteration_bounds = array<i64: 2, 1>, scalar_prefetch = 0 : i64, scratch_operands = 0 : i64, tpu.core_type = #tpu.core_type<tc>, window_params = [{transform_indices = @transform_0, window_bounds = array<i64: 1, 2, 2, 128>}, {transform_indices = @transform_1, window_bounds = array<i64: 1, 2, 2, 128>}, {transform_indices = @transform_2, window_bounds = array<i64: 1, 1, 1, 128>}]} {
    %c0 = arith.constant 0 : index
    %c0_0 = arith.constant 0 : index
    %c0_1 = arith.constant 0 : index
    %c0_2 = arith.constant 0 : index
    %0 = vector.load %arg2[%c0, %c0_0, %c0_1, %c0_2] : memref<1x2x2x128xf32, #tpu.memory_space<vmem>>, vector<1x1x2x128xf32>
    %1 = vector.shape_cast %0 : vector<1x1x2x128xf32> to vector<2x128xf32>
    %c0_3 = arith.constant 0 : index
    %c0_4 = arith.constant 0 : index
    %c0_5 = arith.constant 0 : index
    %c0_6 = arith.constant 0 : index
    %2 = vector.load %arg3[%c0_3, %c0_4, %c0_5, %c0_6] : memref<1x2x2x128xf32, #tpu.memory_space<vmem>>, vector<1x1x2x128xf32>
    %3 = vector.shape_cast %2 : vector<1x1x2x128xf32> to vector<2x128xf32>
    %4 = arith.subf %1, %3 : vector<2x128xf32>
    %5 = arith.mulf %4, %4 : vector<2x128xf32>
    %c0_7 = arith.constant 0 : index
    %c1 = arith.constant 1 : index
    %c0_8 = arith.constant 0 : index
    %c0_9 = arith.constant 0 : index
    %6 = vector.load %arg2[%c0_7, %c1, %c0_8, %c0_9] : memref<1x2x2x128xf32, #tpu.memory_space<vmem>>, vector<1x1x2x128xf32>
    %7 = vector.shape_cast %6 : vector<1x1x2x128xf32> to vector<2x128xf32>
    %c0_10 = arith.constant 0 : index
    %c1_11 = arith.constant 1 : index
    %c0_12 = arith.constant 0 : index
    %c0_13 = arith.constant 0 : index
    %8 = vector.load %arg3[%c0_10, %c1_11, %c0_12, %c0_13] : memref<1x2x2x128xf32, #tpu.memory_space<vmem>>, vector<1x1x2x128xf32>
    %9 = vector.shape_cast %8 : vector<1x1x2x128xf32> to vector<2x128xf32>
    %10 = arith.subf %7, %9 : vector<2x128xf32>
    %11 = arith.mulf %10, %10 : vector<2x128xf32>
    %12 = arith.addf %5, %11 : vector<2x128xf32>
    %13 = math.sqrt %12 : vector<2x128xf32>
    %cst = arith.constant dense<0.000000e+00> : vector<128xf32>
    %14 = vector.multi_reduction <add>, %13, %cst [0] : vector<2x128xf32> to vector<128xf32>
    %15 = vector.shape_cast %14 : vector<128xf32> to vector<1x1x1x128xf32>
    %c0_14 = arith.constant 0 : index
    %c0_15 = arith.constant 0 : index
    %c0_16 = arith.constant 0 : index
    %c0_17 = arith.constant 0 : index
    %16 = vector.load %arg4[%c0_14, %c0_15, %c0_16, %c0_17] : memref<1x1x1x128xf32, #tpu.memory_space<vmem>>, vector<1x1x1x128xf32>
    tpu.vector_store %arg4[%c0_14, %c0_15, %c0_16, %c0_17], %15 {strides = array<i32>} : memref<1x1x1x128xf32, #tpu.memory_space<vmem>>, vector<1x1x1x128xf32>,
    return
  }
  func.func @transform_0(%arg0: i32, %arg1: i32) -> (i32, i32, i32, i32) {
    %c0_i32 = arith.constant 0 : i32
    %c0_i32_0 = arith.constant 0 : i32
    %c0_i32_1 = arith.constant 0 : i32
    return %arg0, %c0_i32, %arg1, %c0_i32_0 : i32, i32, i32, i32
  }
  func.func @transform_1(%arg0: i32, %arg1: i32) -> (i32, i32, i32, i32) {
    %c0_i32 = arith.constant 0 : i32
    %c0_i32_0 = arith.constant 0 : i32
    %c0_i32_1 = arith.constant 0 : i32
    return %arg0, %c0_i32, %arg1, %c0_i32_0 : i32, i32, i32, i32
  }
  func.func @transform_2(%arg0: i32, %arg1: i32) -> (i32, i32, i32, i32) {
    %c0_i32 = arith.constant 0 : i32
    %c0_i32_0 = arith.constant 0 : i32
    %c0_i32_1 = arith.constant 0 : i32
    return %arg0, %arg1, %c0_i32, %c0_i32_0 : i32, i32, i32, i32
  }
}

</mosaic_0001>

<bundles_post_ra>
// kernel: tpu_custom_call.1
= control target key start
LH: loop header
LB: loop body
LE: loop exit
PB: predicated region body
PF: predicated region fallthrough
CT: control target
= control target key end

     0   :  { %7 = vsyncpa [#allocation3], 0  ;;  %s858_s0 = inlined_call_operand.hbm [shape: f32[2,2,2,128], index: 0, kind: input, shape index: {}]   ;;  %s859_s1 = inlined_call_operand.hbm [shape: f32[2,2,2,128], index: 1, kind: input, shape index: {}]   ;;  %s860_s2 = inlined_call_operand.hbm [shape: f32[2,1,1,128], index: 2, kind: output, shape index: {}]  }
   0x1   :  { %9 = vsyncpa [#allocation3 + $0x1], 0 }
   0x2   :  { %10 = vsyncpa [#allocation6], 0 }
   0x3   :  { %12 = vsyncpa [#allocation6 + $0x1], 0 }
   0x4   :  { %13 = vsyncpa [#allocation4], 0 }
   0x5   :  { %15 = vsyncpa [#allocation4 + $0x1], 0  ;;  %s623_s9 = smov 0   ;;  %s625_s10 = smov 0  }
   0x6   :  { %s627_s11 = smov 0   ;;  %s629_s12 = smov 0  }
   0x7   :  { %s631_s13 = smov 0   ;;  %s633_s14 = smov 0  }
   0x8 LB: > { %s364_s15 = sadd.s32 4294967295, %s601_s14   ;;  %s365_s16 = sadd.s32 4294967294, %s601_s14   ;;  %s601_s14 = sphi %s633_s14, %s21_s14   ;;  %s597_s13 = sphi %s631_s13, %s878_s13   ;;  %s593_s12 = sphi %s629_s12, %s877_s12   ;;  %s589_s11 = sphi %s627_s11, %s876_s11   ;;  %s585_s10 = sphi %s625_s10, %s875_s10   ;;  %s581_s9 = sphi %s623_s9, %s874_s9  }
   0x9   : > { %s33_s17 = sadd.s32 1, %s597_s13  ;;  %s42_s18 = sadd.s32 1, %s589_s11 }
   0xa   : > { %p35_p0 = scmp.ge.s32.totalorder %s33_s17, 2  ;;  %p49_p1 = scmp.ne.s32.totalorder %s589_s11, %s585_s10 }
   0xb   : > { %p50_p2 = scmp.eq.s32.totalorder %s601_s14, 0  ;;  %p55_p3 = scmp.ne.s32.totalorder %s585_s10, %s581_s9 }
   0xc   : > { %s880_s17 = smov (%p35_p0, %s33_s17), 0  ;;  %p56_p5 = scmp.eq.s32.totalorder %s364_s15, 0 }
   0xd   : > { %p664_p4 = por %p50_p2, %p49_p1  ;;  %s37_s20 = ssub.s32 %s597_s13, %s880_s17 }
   0xe   : > { %p109_p6 = scmp.eq.s32.totalorder %s364_s15, 1  ;;  %p40_p7 = scmp.eq.s32.totalorder %s37_s20, 0 }
   0xf   : > { %p670_p8 = por %p56_p5, %p55_p3  ;;  %p115_p10 = scmp.eq.s32.totalorder %s365_s16, 1 }
  0x10   : > { %p674_p9 = por %p109_p6, %p49_p1  ;;  %p401_p13 = scmp.lt.s32.totalorder %s601_s14, 2 }
  0x11   : > { %s864_s21 = scalar_select %p670_p8, 1, 0 }
  0x12   : > { %s865_s22 = scalar_select %p674_p9, 1, 0 }
  0x13   : > { %s679_s23 = scalar_select %p40_p7, %s589_s11, %s42_s18  }
  0x14   : > { %p681_p11 = por %p115_p10, %p55_p3  ;;  %s688_s25 = sand.u32 1, %s589_s11  }
  0x15   : > { %s368_s26 = sshll.u32 %s688_s25, 2  ;;  %s382_s27 = sshll.u32 %s597_s13, 6 }
  0x16   : > { %s866_s24 = scalar_select %p681_p11, 1, 0 }
  0x17   : > { %s697_s30 = scalar_lea.hbm %s858_s0, %s382_s27  ;;  %s139_s3 = scalar_lea.vmem [#allocation2], %s368_s26 }
  0x18   : > { %s147_s4 = sshll.u32 %s139_s3, 4  ;;  %p705_p0 = pnand %p401_p13, %p664_p4  ;;  %s701_s4 = int_to_ptr.vmem [resolvable:$true] %s147_s4 }
  0x19   : > { %s136_s6 = scalar_lea.sflag [#allocation3], %s688_s25  ;;  %s455_s7 = scalar_lea.hbm %s697_s30, 64 }
  0x1a   : > { %p456_p2 = scmp.ne.s32.totalorder %s697_s30, %s455_s7  ;;  %p457_p3 = pneg %p705_p0 }
  0x1b   : > { %s460_s16 = scalar_lea.hbm %s858_s0, 128  ;;  %p461_p4 = scmp.lt.u32.totalorder %s697_s30, %s858_s0 }
  0x1c   : > { %p458_p5 = pnand %p457_p3, %p456_p2  ;;  %p462_p7 = scmp.lt.u32.totalorder %s460_s16, %s455_s7 }
  0x1d   : > { %p464_p13 = scmp.lt.u32.totalorder %s455_s7, %s697_s30 }
  0x1e   : > { %p459_p6 = pneg %p458_p5  ;;  %p463_p10 = por %p462_p7, %p461_p4 }
  0x20   : > { %p465_p12 = por %p464_p13, %p463_p10 }
  0x22   : > { %p466_p1 = pnand %p465_p12, %p459_p6 }
  0x24   : > { %469 = shalt.err (!%p466_p1)
}
  0x25   : > { %s470_s20 = scalar_lea.vmem %s701_s4, 64  ;;  %s603_s28 = smov [#allocation2]  }
  0x26   : > { %p471_p2 = scmp.ne.s32.totalorder %s701_s4, %s470_s20  ;;  %s475_s29 = sshll.u32 %s603_s28, 4  ;;  %s476_s29 = int_to_ptr.vmem [resolvable:$false] %s475_s29 }
  0x27   : > { %s477_s3 = scalar_lea.vmem %s476_s29, 128  ;;  %p478_p9 = scmp.lt.s32.totalorder %s701_s4, %s476_s29 }
  0x28   : > { %p473_p5 = pnand %p471_p2, %p457_p3  ;;  %p479_p4 = scmp.lt.s32.totalorder %s477_s3, %s470_s20 }
  0x2a   : > { %p474_p11 = pneg %p473_p5  ;;  %p480_p7 = por %p479_p4, %p478_p9 }
  0x2c   : > { %p481_p10 = pnand %p480_p7, %p474_p11 }
  0x2e   : > { %484 = shalt.err (!%p481_p10)
}
  0x2f   : > { %s604_s7 = smov 32   ;;  %s605_s8 = smov 2  }
  0x30   : > { %393 = dma.hbm_to_vmem [thread:$0]  (!%p705_p0), %s697_s30, 64, %s701_s4, %s136_s6, %s604_s7, %s604_s7, %s605_s8  }
  0x31   : > { %p177_p9 = scmp.lt.s32.totalorder %s601_s14, 3  ;;  %s747_s18 = scalar_lea.hbm %s859_s1, %s382_s27 }
  0x32   : > { %p868_p11 = scmp.ge.s32.totalorder %s601_s14, 1  ;;  %s161_s20 = scalar_lea.vmem [#allocation5], %s368_s26 }
  0x33   : > { %s169_s28 = sshll.u32 %s161_s20, 4  ;;  %s158_s30 = scalar_lea.sflag [#allocation6], %s688_s25  ;;  %s757_s28 = int_to_ptr.vmem [resolvable:$true] %s169_s28 }
  0x34   : > { %p751_p12 = pnand %p868_p11, %p177_p9  ;;  %s485_s4 = scalar_lea.hbm %s747_s18, 64 }
  0x35   : > { %p486_p1 = scmp.ne.s32.totalorder %s747_s18, %s485_s4  ;;  %s490_s29 = scalar_lea.hbm %s859_s1, 128 }
  0x36   : > { %p491_p2 = scmp.lt.u32.totalorder %s747_s18, %s859_s1  ;;  %p492_p5 = scmp.lt.u32.totalorder %s490_s29, %s485_s4 }
  0x37   : > { %p488_p6 = pnand %p486_p1, %p457_p3  ;;  %p494_p7 = scmp.lt.u32.totalorder %s485_s4, %s747_s18 }
  0x38   : > { %p493_p4 = por %p492_p5, %p491_p2 }
  0x39   : > { %p489_p13 = pneg %p488_p6 }
  0x3a   : > { %p495_p10 = por %p494_p7, %p493_p4 }
  0x3c   : > { %p496_p9 = pnand %p495_p10, %p489_p13 }
  0x3e   : > { %499 = shalt.err (!%p496_p9)
}
  0x3f   : > { %s500_s26 = scalar_lea.vmem %s757_s28, 64  ;;  %s606_s16 = smov [#allocation5]  }
  0x40   : > { %p501_p11 = scmp.ne.s32.totalorder %s757_s28, %s500_s26  ;;  %s505_s20 = sshll.u32 %s606_s16, 4  ;;  %s506_s20 = int_to_ptr.vmem [resolvable:$false] %s505_s20 }
  0x41   : > { %s507_s27 = scalar_lea.vmem %s506_s20, 128  ;;  %p508_p8 = scmp.lt.s32.totalorder %s757_s28, %s506_s20 }
  0x42   : > { %p503_p1 = pnand %p501_p11, %p457_p3  ;;  %p509_p2 = scmp.lt.s32.totalorder %s507_s27, %s500_s26 }
  0x44   : > { %p504_p6 = pneg %p503_p1  ;;  %p510_p5 = por %p509_p2, %p508_p8 }
  0x46   : > { %p511_p4 = pnand %p510_p5, %p504_p6 }
  0x48   : > { %514 = shalt.err (!%p511_p4)
}
  0x49   : > { %396 = dma.hbm_to_vmem [thread:$0]  (!%p705_p0), %s747_s18, 64, %s757_s28, %s158_s30, %s604_s7, %s604_s7, %s605_s8  }
  0x4a   : > { %181 = sbr.rel (%p751_p12) target bundleno = 134 (0x86), region = 28  ;;  %s791_s4 = sand.u32 (!%p751_p12), 1, %s585_s10  }
  0x4b   : > { %s375_s6 = sshll.u32 (!%p751_p12), %s791_s4, 2  ;;  %s184_s29 = scalar_lea.sflag (!%p751_p12), [#allocation3], %s791_s4 }
  0x4c   : > { %s187_s5 = scalar_lea.vmem (!%p751_p12), [#allocation2], %s375_s6  ;;  %p870_p8 = scmp.ne.s32.totalorder (!%p751_p12), %s864_s21, 0 }
  0x51   : > { %568 = dma.done.wait (%p870_p8), %s184_s29, 64  }
  0x52   : > { %570 = vsyncadd (%p870_p8), %s184_s29, 4294967232  ;;  %s193_s25 = scalar_lea.sflag [#allocation6], %s791_s4  ;;  %s196_s7 = scalar_lea.vmem [#allocation5], %s375_s6 }
  0x53   : > { %572 = dma.done.wait (%p870_p8), %s193_s25, 64  }
  0x54   : > { %574 = vsyncadd (%p870_p8), %s193_s25, 4294967232  ;;  %v221_v0 = vld [vmem:[%s187_s5] sm:$0x3]  ;;  %v222_v1 = vld [vmem:[%s196_s7] sm:$0x3]  ;;  %vm239_vm2 = vcmask 1041408  }
  0x55   : > { %v377_v2 = vld [vmem:[%s187_s5 + $0x2] sm:$0x3]  ;;  %v223_v3 = vsub.f32 %v221_v0, %v222_v1  ;;  %v378_v4 = vld [vmem:[%s196_s7 + $0x2] sm:$0x3]  ;;  %s220_s21 = scalar_lea.vmem [#allocation7], %s791_s4  ;;  %s379_s18 = sshll.u32 %s593_s12, 4 }
  0x56   : > { %v229_v5 = vsub.f32 %v377_v2, %v378_v4  ;;  %s262_s8 = sshll.u32 %s220_s21, 4  ;;  %s811_s30 = scalar_lea.hbm %s860_s2, %s379_s18  ;;  %s806_s8 = int_to_ptr.vmem [resolvable:$true] %s262_s8 }
  0x57   : > { %v224_v6 = vmul.f32 %v223_v3, %v223_v3  ;;  %s249_s3 = scalar_lea.sflag [#allocation4], %s791_s4  ;;  %s515_s15 = scalar_lea.vmem %s806_s8, 16 }
  0x58   : > { %v230_v7 = vmul.f32 %v229_v5, %v229_v5  ;;  %p516_p0 = scmp.ne.s32.totalorder %s806_s8, %s515_s15  ;;  %p871_p3 = scmp.ne.s32.totalorder %s865_s22, 0 }
  0x59   : > { %s607_s12 = smov [#allocation7]  }
  0x5a   : > { %v231_v8 = vadd.f32 %v230_v7, %v224_v6  ;;  %p517_p12 = pnand %p516_p0, %p871_p3  ;;  %s519_s26 = sshll.u32 %s607_s12, 4  ;;  %s520_s26 = int_to_ptr.vmem [resolvable:$false] %s519_s26 }
  0x5b   : > { %s521_s16 = scalar_lea.vmem %s520_s26, 32  ;;  %p522_p7 = scmp.lt.s32.totalorder %s806_s8, %s520_s26 }
  0x5c   : > { %453 = vrsqrt.f32 %v231_v8  ;;  %vm234_vm0 = vcmp.eq.f32.partialorder %v231_v8, inf  ;;  %v237_v10 = vand.u32 2147483648, %v231_v8  ;;  %vm236_vm1 = vcmp.eq.f32.partialorder %v231_v8, 0.0  ;;  %p518_p13 = pneg %p517_p12  ;;  %p523_p10 = scmp.lt.s32.totalorder %s521_s16, %s515_s15 }
  0x5e   : > { %p524_p9 = por %p523_p10, %p522_p7 }
  0x60   : > { %p525_p11 = pnand %p524_p9, %p518_p13 }
  0x66   : > { %v454_v9 = vpop.eup %453 }
  0x67   : > { %v233_v11 = vmul.f32 %v454_v9, %v231_v8 }
  0x69   : > { %v235_v12 = vsel %vm234_vm0, %v231_v8, %v233_v11 }
  0x6a   : > { %v238_v13 = vsel %vm236_vm1, %v237_v10, %v235_v12 }
  0x6b   : > { %v240_v14 = vsel %vm239_vm2, %v238_v13, 0.0 }
  0x6c   : > { %v241_v15 = vrot.slane %v240_v14, 4 }
  0x6e   : > { %v242_v16 = vadd.f32 %v241_v15, %v240_v14 }
  0x70   : > { %v243_v17 = vrot.slane %v242_v16, 2 }
  0x72   : > { %v244_v18 = vadd.f32 %v243_v17, %v242_v16 }
  0x74   : > { %v245_v19 = vrot.slane %v244_v18, 1 }
  0x76   : > { %v246_v20 = vadd.f32 %v245_v19, %v244_v18 }
  0x78   : > { %247 = vst [vmem:[%s220_s21] sm:$0x1] %v246_v20 }
  0x79   : > { %528 = shalt.err (!%p525_p11)
}
  0x7a   : > { %s529_s20 = scalar_lea.hbm %s811_s30, 16  ;;  %s533_s6 = scalar_lea.hbm %s860_s2, 32 }
  0x7b   : > { %p530_p1 = scmp.ne.s32.totalorder %s811_s30, %s529_s20  ;;  %p534_p5 = scmp.lt.u32.totalorder %s811_s30, %s860_s2 }
  0x7c   : > { %p535_p4 = scmp.lt.u32.totalorder %s533_s6, %s529_s20  ;;  %p537_p0 = scmp.lt.u32.totalorder %s529_s20, %s811_s30 }
  0x7d   : > { %p531_p6 = pnand %p530_p1, %p871_p3 }
  0x7e   : > { %p536_p8 = por %p535_p4, %p534_p5 }
  0x7f   : > { %p532_p2 = pneg %p531_p6 }
  0x80   : > { %p538_p12 = por %p537_p0, %p536_p8 }
  0x82   : > { %p539_p13 = pnand %p538_p12, %p532_p2 }
  0x84   : > { %542 = shalt.err (!%p539_p13)
}
  0x85   : > { %388 = dma.vmem_to_hbm [thread:$0]  (%p871_p3), %s806_s8, 16, %s811_s30, %s249_s3  }
  0x86 PF: > { %s274_s25 = sand.u32 1, %s581_s9   ;;  %p872_p7 = scmp.ne.s32.totalorder %s866_s24, 0 }
  0x87   : > { %p873_p10 = scmp.ge.s32.totalorder %s601_s14, 2  ;;  %s275_s7 = scalar_lea.sflag [#allocation4], %s274_s25 }
  0x89   : > { %p398_p9 = pnand %p873_p10, %p872_p7 }
  0x8b   : > { %576 = dma.done.wait (!%p398_p9), %s275_s7, 16  }
  0x8c   : > { %578 = vsyncadd (!%p398_p9), %s275_s7, 4294967280  ;;  %s21_s14 = sadd.s32 1, %s601_s14   ;;  %s874_s9 = smov %s585_s10 }
  0x8d   : > { %p18_p11 = scmp.ge.s32.totalorder %s21_s14, 4   ;;  %s875_s10 = smov %s589_s11 }
  0x8e   : > { %s876_s11 = smov %s679_s23  ;;  %s877_s12 = smov %s597_s13 }
  0x8f   : > { %s878_s13 = smov %s880_s17  ;;  %20 = sbr.rel (!%p18_p11) target bundleno = 8 (0x8), region = 88 }
  0x96   :  { %279 = vsyncpa [#allocation3], 1 }
  0x97   :  { %281 = vsyncpa [#allocation3 + $0x1], 1 }
  0x98   :  { %282 = vsyncpa [#allocation6], 1 }
  0x99   :  { %284 = vsyncpa [#allocation6 + $0x1], 1 }
  0x9a   :  { %285 = vsyncpa [#allocation4], 1 }
  0x9b   :  { %287 = vsyncpa [#allocation4 + $0x1], 1 }

</bundles_post_ra>
